<compile_context>
chip_gen: v7x
topology: tpu7x:2x2x1
jax: 0.10.0
libtpu: 0.0.40
codegen_flags: <defaults>
</compile_context>

<pallas_src>
import functools

import jax
import jax.numpy as jnp
from jax import lax
from jax.experimental import pallas as pl
from jax.experimental.pallas import tpu as pltpu

_LANE = 128
_SUBLANE = 8


def _normalize_kernel(x_ref, o_ref, *, power):
    # x_ref / o_ref: (bn, C, th, tw) VMEM tiles.  C is a leading (untiled)
    # block dim, so channel extraction is a plain VMEM sub-view and the
    # reduction is a short chain of VALU adds on lane-dense (th, tw) slabs.
    C = x_ref.shape[1]

    def chan_pow(v):
        # x^p: repeated multiplication (pure VPU) for small integer p; p == 2
        # is the common case.  Matches torch's x.pow(p) (including sign for
        # odd p); non-integer p falls back to jnp.power.
        if power == 2:
            return v * v
        if isinstance(power, int) and power > 0:
            r = v
            for _ in range(power - 1):
                r = r * v
            return r
        return jnp.power(v, float(power))

    if C <= 16:
        # Accumulate channel-by-channel from the ref: keeps live f32
        # intermediates to a single (bn, th, tw) slab instead of full-tile
        # f32 copies of x and x^p (pure VMEM-pressure relief, same HBM bytes).
        s = None
        for c in range(C):
            xp = chan_pow(x_ref[:, c, :, :].astype(jnp.float32))
            s = xp if s is None else s + xp
    else:
        x = x_ref[...].astype(jnp.float32)
        s = jnp.sum(chan_pow(x), axis=1)

    # s^(-1/p): rsqrt rides the otherwise-idle EUP slot for p == 2 instead of
    # sqrt + per-element divide.
    # NOTE: like the PyTorch module there is no eps guard -- an all-zero
    # channel vector yields Inf/NaN, matching torch semantics.
    if power == 2:
        inv = lax.rsqrt(s)
    else:
        inv = jnp.power(s, -1.0 / float(power))

    if C <= 16:
        for c in range(C):
            xc = x_ref[:, c, :, :].astype(jnp.float32)
            o_ref[:, c, :, :] = (xc * inv).astype(o_ref.dtype)
    else:
        o_ref[...] = (x * inv[:, None, :, :]).astype(o_ref.dtype)


def _largest_divisor_leq(n, cap):
    cap = max(1, min(n, cap))
    while n % cap != 0:
        cap -= 1
    return cap


def _device_tuning():
    """Per-generation block-byte target, VMEM budget and megacore hint."""
    target = 2 << 20        # bytes of input per grid step
    vmem_limit = 32 << 20   # scoped VMEM limit (v5e default is only 16 MiB)
    min_steps = 1           # keep >= this many grid steps (dual-TC parts)
    try:
        kind = jax.devices()[0].device_kind.lower()
    except Exception:  # defensive: never let tuning break the kernel
        kind = ""
    if "v7" in kind:
        # 64 MiB physical VMEM, ~3.2 TB/s HBM, 2 TensorCores per chip.
        target, vmem_limit, min_steps = 2 << 20, 32 << 20, 2
    elif "v6" in kind:
        # 128 MiB VMEM: ample headroom, slightly larger blocks are free.
        target, vmem_limit = 4 << 20, 64 << 20
    elif "v5p" in kind:
        target, vmem_limit, min_steps = 2 << 20, 64 << 20, 2
    elif "v5" in kind:
        # v5e: per-step overhead already hidden at ~1-2 MiB blocks.
        target, vmem_limit = 2 << 20, 32 << 20
    return target, vmem_limit, min_steps


def _tile_plan(N, C, H, W, itemsize, target_bytes, min_steps):
    # Lane axis: keep W whole unless a minimal-height block already exceeds
    # the byte target; if split, use wide multiples of 128 (never narrow).
    min_th = H if H < _SUBLANE else _SUBLANE
    tw = W
    if W > _LANE and C * min_th * W * itemsize > target_bytes:
        tw = (target_bytes // (C * min_th * itemsize)) // _LANE * _LANE
        tw = max(4 * _LANE, tw)
        tw = min(tw, (W // _LANE) * _LANE)
    grid_w = pl.cdiv(W, tw)

    # Sublane (H) axis: multiples of 8, or the whole of H.
    if C * H * tw * itemsize > target_bytes and H >= _SUBLANE:
        th = (target_bytes // (C * tw * itemsize)) // _SUBLANE * _SUBLANE
        th = max(_SUBLANE, min(th, H))
    else:
        th = H
    grid_h = pl.cdiv(H, th)

    # Batch axis: grow blocks toward the byte target; on dual-TC parts keep at
    # least `min_steps` grid steps so both cores get work.  Single-TC v5e/v6e
    # take the whole batch if it fits (no point paying an extra grid step).
    block_bytes = C * th * tw * itemsize
    bn = max(1, target_bytes // max(1, block_bytes))
    if min_steps > 1 and grid_h * grid_w == 1 and N >= min_steps:
        bn = min(bn, N // min_steps)
    bn = _largest_divisor_leq(N, min(bn, N))
    grid_n = pl.cdiv(N, bn)

    return bn, th, tw, (grid_n, grid_h, grid_w)


def normalize_pallas(x, power=2):
    """L_p normalization over the channel axis (dim 1) of an NCHW tensor."""
    if float(power) == int(power):
        power = int(power)

    N, C, H, W = x.shape
    itemsize = jnp.dtype(x.dtype).itemsize

    target_bytes, vmem_limit, min_steps = _device_tuning()
    bn, th, tw, grid = _tile_plan(N, C, H, W, itemsize, target_bytes, min_steps)

    kernel = functools.partial(_normalize_kernel, power=power)
    spec = pl.BlockSpec((bn, C, th, tw), lambda n, h, w: (n, 0, h, w))

    flops_per_elem = (power if isinstance(power, int) and power > 0 else 8) + 2
    cost = pl.CostEstimate(
        flops=flops_per_elem * x.size,
        transcendentals=N * H * W,
        bytes_accessed=2 * x.size * itemsize,
    )

    return pl.pallas_call(
        kernel,
        out_shape=jax.ShapeDtypeStruct((N, C, H, W), x.dtype),
        grid=grid,
        in_specs=[spec],
        out_specs=spec,
        compiler_params=pltpu.CompilerParams(
            dimension_semantics=("parallel", "parallel", "parallel"),
            vmem_limit_bytes=vmem_limit,
        ),
        cost_estimate=cost,
    )(x)


def normalize_ref(x, power=2):
    # Pure-JAX reference mirroring the PyTorch forward exactly.
    norm = jnp.power(jnp.sum(jnp.power(x, power), axis=1, keepdims=True),
                     1.0 / power)
    return x / norm


if __name__ == "__main__":
    key = jax.random.PRNGKey(0)
    # Small NCHW input consistent with typical use of Normalize.
    x = jax.random.normal(key, (2, 4, 16, 16), dtype=jnp.float32)

    out = jax.block_until_ready(normalize_pallas(x, power=2))
    ref = normalize_ref(x, power=2)

    assert out.shape == x.shape
    assert out.dtype == x.dtype
    assert jnp.allclose(out, ref, atol=1e-5, rtol=1e-5), "mismatch vs reference"

    print("KERNEL_OK")
</pallas_src>

<mosaic_0001>
module attributes {stable_mosaic.version = 11 : i64} {
  func.func @_normalize_kernel(%arg0: i32, %arg1: i32, %arg2: i32, %arg3: memref<2x4x16x16xf32, #tpu.memory_space<vmem>>, %arg4: memref<2x4x16x16xf32, #tpu.memory_space<vmem>>) attributes {dimension_semantics = [#tpu.dimension_semantics<parallel>, #tpu.dimension_semantics<parallel>, #tpu.dimension_semantics<parallel>], iteration_bounds = array<i64: 1, 1, 1>, scalar_prefetch = 0 : i64, scratch_operands = 0 : i64, tpu.core_type = #tpu.core_type<tc>, window_params = [{transform_indices = @transform_0, window_bounds = array<i64: 2, 4, 16, 16>}, {transform_indices = @transform_1, window_bounds = array<i64: 2, 4, 16, 16>}]} {
    %c0 = arith.constant 0 : index
    %c0_0 = arith.constant 0 : index
    %c0_1 = arith.constant 0 : index
    %c0_2 = arith.constant 0 : index
    %0 = vector.load %arg3[%c0, %c0_0, %c0_1, %c0_2] : memref<2x4x16x16xf32, #tpu.memory_space<vmem>>, vector<2x1x16x16xf32>
    %1 = vector.shape_cast %0 : vector<2x1x16x16xf32> to vector<2x16x16xf32>
    %2 = arith.mulf %1, %1 : vector<2x16x16xf32>
    %c0_3 = arith.constant 0 : index
    %c1 = arith.constant 1 : index
    %c0_4 = arith.constant 0 : index
    %c0_5 = arith.constant 0 : index
    %3 = vector.load %arg3[%c0_3, %c1, %c0_4, %c0_5] : memref<2x4x16x16xf32, #tpu.memory_space<vmem>>, vector<2x1x16x16xf32>
    %4 = vector.shape_cast %3 : vector<2x1x16x16xf32> to vector<2x16x16xf32>
    %5 = arith.mulf %4, %4 : vector<2x16x16xf32>
    %6 = arith.addf %2, %5 : vector<2x16x16xf32>
    %c0_6 = arith.constant 0 : index
    %c2 = arith.constant 2 : index
    %c0_7 = arith.constant 0 : index
    %c0_8 = arith.constant 0 : index
    %7 = vector.load %arg3[%c0_6, %c2, %c0_7, %c0_8] : memref<2x4x16x16xf32, #tpu.memory_space<vmem>>, vector<2x1x16x16xf32>
    %8 = vector.shape_cast %7 : vector<2x1x16x16xf32> to vector<2x16x16xf32>
    %9 = arith.mulf %8, %8 : vector<2x16x16xf32>
    %10 = arith.addf %6, %9 : vector<2x16x16xf32>
    %c0_9 = arith.constant 0 : index
    %c3 = arith.constant 3 : index
    %c0_10 = arith.constant 0 : index
    %c0_11 = arith.constant 0 : index
    %11 = vector.load %arg3[%c0_9, %c3, %c0_10, %c0_11] : memref<2x4x16x16xf32, #tpu.memory_space<vmem>>, vector<2x1x16x16xf32>
    %12 = vector.shape_cast %11 : vector<2x1x16x16xf32> to vector<2x16x16xf32>
    %13 = arith.mulf %12, %12 : vector<2x16x16xf32>
    %14 = arith.addf %10, %13 : vector<2x16x16xf32>
    %15 = math.rsqrt %14 : vector<2x16x16xf32>
    %c0_12 = arith.constant 0 : index
    %c0_13 = arith.constant 0 : index
    %c0_14 = arith.constant 0 : index
    %c0_15 = arith.constant 0 : index
    %16 = vector.load %arg3[%c0_12, %c0_13, %c0_14, %c0_15] : memref<2x4x16x16xf32, #tpu.memory_space<vmem>>, vector<2x1x16x16xf32>
    %17 = vector.shape_cast %16 : vector<2x1x16x16xf32> to vector<2x16x16xf32>
    %18 = arith.mulf %17, %15 : vector<2x16x16xf32>
    %c0_16 = arith.constant 0 : index
    %c0_17 = arith.constant 0 : index
    %c0_18 = arith.constant 0 : index
    %c0_19 = arith.constant 0 : index
    %19 = vector.load %arg4[%c0_16, %c0_17, %c0_18, %c0_19] : memref<2x4x16x16xf32, #tpu.memory_space<vmem>>, vector<2x1x16x16xf32>
    %20 = vector.shape_cast %19 : vector<2x1x16x16xf32> to vector<2x16x16xf32>
    %21 = vector.shape_cast %18 : vector<2x16x16xf32> to vector<2x1x16x16xf32>
    tpu.vector_store %arg4[%c0_16, %c0_17, %c0_18, %c0_19], %21 {strides = array<i32>} : memref<2x4x16x16xf32, #tpu.memory_space<vmem>>, vector<2x1x16x16xf32>,
    %c0_20 = arith.constant 0 : index
    %c1_21 = arith.constant 1 : index
    %c0_22 = arith.constant 0 : index
    %c0_23 = arith.constant 0 : index
    %22 = vector.load %arg3[%c0_20, %c1_21, %c0_22, %c0_23] : memref<2x4x16x16xf32, #tpu.memory_space<vmem>>, vector<2x1x16x16xf32>
    %23 = vector.shape_cast %22 : vector<2x1x16x16xf32> to vector<2x16x16xf32>
    %24 = arith.mulf %23, %15 : vector<2x16x16xf32>
    %c0_24 = arith.constant 0 : index
    %c1_25 = arith.constant 1 : index
    %c0_26 = arith.constant 0 : index
    %c0_27 = arith.constant 0 : index
    %25 = vector.load %arg4[%c0_24, %c1_25, %c0_26, %c0_27] : memref<2x4x16x16xf32, #tpu.memory_space<vmem>>, vector<2x1x16x16xf32>
    %26 = vector.shape_cast %25 : vector<2x1x16x16xf32> to vector<2x16x16xf32>
    %27 = vector.shape_cast %24 : vector<2x16x16xf32> to vector<2x1x16x16xf32>
    tpu.vector_store %arg4[%c0_24, %c1_25, %c0_26, %c0_27], %27 {strides = array<i32>} : memref<2x4x16x16xf32, #tpu.memory_space<vmem>>, vector<2x1x16x16xf32>,
    %c0_28 = arith.constant 0 : index
    %c2_29 = arith.constant 2 : index
    %c0_30 = arith.constant 0 : index
    %c0_31 = arith.constant 0 : index
    %28 = vector.load %arg3[%c0_28, %c2_29, %c0_30, %c0_31] : memref<2x4x16x16xf32, #tpu.memory_space<vmem>>, vector<2x1x16x16xf32>
    %29 = vector.shape_cast %28 : vector<2x1x16x16xf32> to vector<2x16x16xf32>
    %30 = arith.mulf %29, %15 : vector<2x16x16xf32>
    %c0_32 = arith.constant 0 : index
    %c2_33 = arith.constant 2 : index
    %c0_34 = arith.constant 0 : index
    %c0_35 = arith.constant 0 : index
    %31 = vector.load %arg4[%c0_32, %c2_33, %c0_34, %c0_35] : memref<2x4x16x16xf32, #tpu.memory_space<vmem>>, vector<2x1x16x16xf32>
    %32 = vector.shape_cast %31 : vector<2x1x16x16xf32> to vector<2x16x16xf32>
    %33 = vector.shape_cast %30 : vector<2x16x16xf32> to vector<2x1x16x16xf32>
    tpu.vector_store %arg4[%c0_32, %c2_33, %c0_34, %c0_35], %33 {strides = array<i32>} : memref<2x4x16x16xf32, #tpu.memory_space<vmem>>, vector<2x1x16x16xf32>,
    %c0_36 = arith.constant 0 : index
    %c3_37 = arith.constant 3 : index
    %c0_38 = arith.constant 0 : index
    %c0_39 = arith.constant 0 : index
    %34 = vector.load %arg3[%c0_36, %c3_37, %c0_38, %c0_39] : memref<2x4x16x16xf32, #tpu.memory_space<vmem>>, vector<2x1x16x16xf32>
    %35 = vector.shape_cast %34 : vector<2x1x16x16xf32> to vector<2x16x16xf32>
    %36 = arith.mulf %35, %15 : vector<2x16x16xf32>
    %c0_40 = arith.constant 0 : index
    %c3_41 = arith.constant 3 : index
    %c0_42 = arith.constant 0 : index
    %c0_43 = arith.constant 0 : index
    %37 = vector.load %arg4[%c0_40, %c3_41, %c0_42, %c0_43] : memref<2x4x16x16xf32, #tpu.memory_space<vmem>>, vector<2x1x16x16xf32>
    %38 = vector.shape_cast %37 : vector<2x1x16x16xf32> to vector<2x16x16xf32>
    %39 = vector.shape_cast %36 : vector<2x16x16xf32> to vector<2x1x16x16xf32>
    tpu.vector_store %arg4[%c0_40, %c3_41, %c0_42, %c0_43], %39 {strides = array<i32>} : memref<2x4x16x16xf32, #tpu.memory_space<vmem>>, vector<2x1x16x16xf32>,
    return
  }
  func.func @transform_0(%arg0: i32, %arg1: i32, %arg2: i32) -> (i32, i32, i32, i32) {
    %c0_i32 = arith.constant 0 : i32
    %c0_i32_0 = arith.constant 0 : i32
    return %arg0, %c0_i32, %arg1, %arg2 : i32, i32, i32, i32
  }
  func.func @transform_1(%arg0: i32, %arg1: i32, %arg2: i32) -> (i32, i32, i32, i32) {
    %c0_i32 = arith.constant 0 : i32
    %c0_i32_0 = arith.constant 0 : i32
    return %arg0, %c0_i32, %arg1, %arg2 : i32, i32, i32, i32
  }
}

</mosaic_0001>

<bundles_post_ra>
// kernel: tpu_custom_call.1
= control target key start
LH: loop header
LB: loop body
LE: loop exit
PB: predicated region body
PF: predicated region fallthrough
CT: control target
= control target key end

     0   :  { %6 = vsyncpa [#allocation3], 0  ;;  %s259_s0 = inlined_call_operand.hbm [shape: f32[2,4,16,16], index: 0, kind: input, shape index: {}]   ;;  %s260_s1 = inlined_call_operand.hbm [shape: f32[2,4,16,16], index: 1, kind: output, shape index: {}]  }
   0x1   :  { %7 = vsyncpa [#allocation4], 0  ;;  %s199_s6 = smov [#allocation2]   ;;  %s151_s10 = scalar_lea.hbm %s259_s0, 2048 }
   0x2   :  { %s13_s7 = sshll.u32 %s199_s6, 4  ;;  %p152_p0 = scmp.ne.s32.totalorder %s259_s0, %s151_s10  ;;  %s14_s7 = int_to_ptr.vmem [resolvable:$true] %s13_s7 }
   0x3   :  { %p155_p1 = scmp.lt.u32.totalorder %s151_s10, %s259_s0 }
   0x5   :  { %p157_p2 = pnand %p155_p1, %p152_p0 }
   0x7   :  { %160 = shalt.err (!%p157_p2)
}
   0x8   :  { %s161_s15 = scalar_lea.vmem %s14_s7, 2048  ;;  %p166_p4 = scmp.lt.s32.totalorder %s14_s7, %s14_s7 }
   0x9   :  { %p162_p3 = scmp.ne.s32.totalorder %s14_s7, %s161_s15  ;;  %p167_p5 = scmp.lt.s32.totalorder %s161_s15, %s161_s15 }
   0xb   :  { %p168_p6 = por %p167_p5, %p166_p4 }
   0xd   :  { %p169_p7 = pnand %p168_p6, %p162_p3 }
   0xf   :  { %172 = shalt.err (!%p169_p7)
}
  0x10   :  { %s200_s16 = smov 128   ;;  %s201_s17 = smov 8  }
  0x11   :  { %19 = dma.hbm_to_vmem [thread:$0]  %s259_s0, 2048, %s14_s7, [#allocation3], %s200_s16, %s200_s16, %s201_s17  }
  0x12   :  { %195 = dma.done.wait [#allocation3], 2048  }
  0x13   :  { %196 = vsyncadd [#allocation3], 4294965248  ;;  %v23_v0 = vld [vmem:[#allocation2] sm:$0xff]  ;;  %v32_v1 = vld [vmem:[#allocation2 + $0x10] sm:$0xff]  ;;  %vm78_vm0 = vcmask 130048   ;;  %s202_s0 = smov [#allocation5]  }
  0x14   :  { %v45_v2 = vld [vmem:[#allocation2 + $0x20] sm:$0xff]  ;;  %v27_v3 = vmul.f32 %v23_v0, %v23_v0  ;;  %v36_v4 = vmul.f32 %v32_v1, %v32_v1  ;;  %v58_v6 = vld [vmem:[#allocation2 + $0x30] sm:$0xff]  ;;  %v24_v7 = vld [vmem:[#allocation2 + $0x8] sm:$0xff]  ;;  %s127_s20 = sshll.u32 %s202_s0, 4  ;;  %s128_s20 = int_to_ptr.vmem [resolvable:$true] %s127_s20 }
  0x15   :  { %v49_v5 = vmul.f32 %v45_v2, %v45_v2  ;;  %v33_v8 = vld [vmem:[#allocation2 + $0x18] sm:$0xff]  ;;  %v28_v9 = vmul.f32 %v24_v7, %v24_v7  ;;  %v46_v11 = vld [vmem:[#allocation2 + $0x28] sm:$0xff]  ;;  %v25_v13 = vld [vmem:[#allocation2 + $0x40] sm:$0xff]  ;;  %v62_v15 = vmul.f32 %v58_v6, %v58_v6  ;;  %s173_s21 = scalar_lea.vmem %s128_s20, 2048  ;;  %p178_p9 = scmp.lt.s32.totalorder %s128_s20, %s128_s20 }
  0x16   :  { %v37_v10 = vmul.f32 %v33_v8, %v33_v8  ;;  %v59_v12 = vld [vmem:[#allocation2 + $0x38] sm:$0xff]  ;;  %v40_v14 = vadd.f32 %v36_v4, %v27_v3  ;;  %v50_v16 = vmul.f32 %v46_v11, %v46_v11  ;;  %v29_v17 = vmul.f32 %v25_v13, %v25_v13  ;;  %v34_v18 = vld [vmem:[#allocation2 + $0x50] sm:$0xff]  ;;  %v47_v19 = vld [vmem:[#allocation2 + $0x60] sm:$0xff]  ;;  %p174_p8 = scmp.ne.s32.totalorder %s128_s20, %s173_s21  ;;  %p179_p10 = scmp.lt.s32.totalorder %s173_s21, %s173_s21 }
  0x17   :  { %v60_v20 = vld [vmem:[#allocation2 + $0x70] sm:$0xff]  ;;  %v63_v22 = vmul.f32 %v59_v12, %v59_v12  ;;  %v38_v23 = vmul.f32 %v34_v18, %v34_v18  ;;  %v51_v24 = vmul.f32 %v47_v19, %v47_v19  ;;  %v26_v25 = vld [vmem:[#allocation2 + $0x48] sm:$0xff]  ;;  %v35_v26 = vld [vmem:[#allocation2 + $0x58] sm:$0xff] }
  0x18   :  { %v41_v21 = vadd.f32 %v37_v10, %v28_v9  ;;  %v48_v27 = vld [vmem:[#allocation2 + $0x68] sm:$0xff]  ;;  %v53_v28 = vadd.f32 %v49_v5, %v40_v14  ;;  %v30_v29 = vmul.f32 %v26_v25, %v26_v25  ;;  %v39_v30 = vmul.f32 %v35_v26, %v35_v26  ;;  %v61_v32 = vld [vmem:[#allocation2 + $0x78] sm:$0xff]  ;;  %p180_p11 = por %p179_p10, %p178_p9 }
  0x19   :  { %v52_v31 = vmul.f32 %v48_v27, %v48_v27  ;;  %v42_v34 = vadd.f32 %v38_v23, %v29_v17  ;;  %v64_v35 = vmul.f32 %v60_v20, %v60_v20  ;;  %v65_v38 = vmul.f32 %v61_v32, %v61_v32 }
  0x1a   :  { %v54_v33 = vadd.f32 %v50_v16, %v41_v21  ;;  %v66_v36 = vadd.f32 %v62_v15, %v53_v28  ;;  %v43_v37 = vadd.f32 %v39_v30, %v30_v29  ;;  %p181_p12 = pnand %p180_p11, %p174_p8 }
  0x1b   :  { %v55_v40 = vadd.f32 %v51_v24, %v42_v34 }
  0x1c   :  { %v67_v39 = vadd.f32 %v63_v22, %v54_v33  ;;  %143 = vrsqrt.f32 %v66_v36  ;;  %v56_v41 = vadd.f32 %v52_v31, %v43_v37 }
  0x1d   :  { %v68_v42 = vadd.f32 %v64_v35, %v55_v40 }
  0x1e   :  { %145 = vrsqrt.f32 %v67_v39  ;;  %v69_v43 = vadd.f32 %v65_v38, %v56_v41 }
  0x1f   :  { %147 = vrsqrt.f32 %v68_v42 }
  0x20   :  { %149 = vrsqrt.f32 %v69_v43 }
  0x26   :  { %v144_v44 = vpop.eup %143 }
  0x27   :  { %v74_v46 = vmul.f32 %v144_v44, %v23_v0  ;;  %v87_v47 = vmul.f32 %v144_v44, %v32_v1  ;;  %v100_v48 = vmul.f32 %v144_v44, %v45_v2  ;;  %v113_v49 = vmul.f32 %v144_v44, %v58_v6 }
  0x28   :  { %v146_v45 = vpop.eup %145 }
  0x29   :  { %v75_v50 = vmul.f32 %v146_v45, %v24_v7  ;;  %v88_v51 = vmul.f32 %v146_v45, %v33_v8  ;;  %v101_v52 = vmul.f32 %v146_v45, %v46_v11  ;;  %v114_v53 = vmul.f32 %v146_v45, %v59_v12  ;;  %v148_v54 = vpop.eup %147  ;;  %79 = vst.msk [vmem:[#allocation5] sm:$0xff] %vm78_vm0, %v74_v46 }
  0x2a   :  { %92 = vst.msk [vmem:[#allocation5 + $0x10] sm:$0xff] %vm78_vm0, %v87_v47  ;;  %105 = vst.msk [vmem:[#allocation5 + $0x20] sm:$0xff] %vm78_vm0, %v100_v48  ;;  %v150_v55 = vpop.eup %149  ;;  %v76_v56 = vmul.f32 %v148_v54, %v25_v13  ;;  %v89_v57 = vmul.f32 %v148_v54, %v34_v18  ;;  %v102_v58 = vmul.f32 %v148_v54, %v47_v19 }
  0x2b   :  { %118 = vst.msk [vmem:[#allocation5 + $0x30] sm:$0xff] %vm78_vm0, %v113_v49  ;;  %80 = vst.msk [vmem:[#allocation5 + $0x8] sm:$0xff] %vm78_vm0, %v75_v50  ;;  %v115_v59 = vmul.f32 %v148_v54, %v60_v20  ;;  %v77_v60 = vmul.f32 %v150_v55, %v26_v25  ;;  %v90_v61 = vmul.f32 %v150_v55, %v35_v26 }
  0x2c   :  { %93 = vst.msk [vmem:[#allocation5 + $0x18] sm:$0xff] %vm78_vm0, %v88_v51  ;;  %106 = vst.msk [vmem:[#allocation5 + $0x28] sm:$0xff] %vm78_vm0, %v101_v52  ;;  %v103_v62 = vmul.f32 %v150_v55, %v48_v27  ;;  %v116_v63 = vmul.f32 %v150_v55, %v61_v32 }
  0x2d   :  { %119 = vst.msk [vmem:[#allocation5 + $0x38] sm:$0xff] %vm78_vm0, %v114_v53  ;;  %81 = vst.msk [vmem:[#allocation5 + $0x40] sm:$0xff] %vm78_vm0, %v76_v56 }
  0x2e   :  { %94 = vst.msk [vmem:[#allocation5 + $0x50] sm:$0xff] %vm78_vm0, %v89_v57  ;;  %107 = vst.msk [vmem:[#allocation5 + $0x60] sm:$0xff] %vm78_vm0, %v102_v58 }
  0x2f   :  { %120 = vst.msk [vmem:[#allocation5 + $0x70] sm:$0xff] %vm78_vm0, %v115_v59  ;;  %82 = vst.msk [vmem:[#allocation5 + $0x48] sm:$0xff] %vm78_vm0, %v77_v60 }
  0x30   :  { %95 = vst.msk [vmem:[#allocation5 + $0x58] sm:$0xff] %vm78_vm0, %v90_v61  ;;  %108 = vst.msk [vmem:[#allocation5 + $0x68] sm:$0xff] %vm78_vm0, %v103_v62 }
  0x31   :  { %121 = vst.msk [vmem:[#allocation5 + $0x78] sm:$0xff] %vm78_vm0, %v116_v63 }
  0x32   :  { %184 = shalt.err (!%p181_p12)
}
  0x33   :  { %s185_s24 = scalar_lea.hbm %s260_s1, 2048 }
  0x34   :  { %p186_p13 = scmp.ne.s32.totalorder %s260_s1, %s185_s24  ;;  %p189_p0 = scmp.lt.u32.totalorder %s185_s24, %s260_s1 }
  0x36   :  { %p191_p1 = pnand %p189_p0, %p186_p13 }
  0x38   :  { %194 = shalt.err (!%p191_p1)
}
  0x39   :  { %133 = dma.vmem_to_hbm [thread:$0]  %s128_s20, 2048, %s260_s1, [#allocation4], %s200_s16, %s200_s16, %s201_s17  }
  0x3a   :  { %197 = dma.done.wait [#allocation4], 2048  }
  0x3b   :  { %198 = vsyncadd [#allocation4], 4294965248 }
  0x3c   :  { %137 = vsyncpa [#allocation3], 1 }
  0x3d   :  { %138 = vsyncpa [#allocation4], 1 }

</bundles_post_ra>
